<compile_context>
chip_gen: v6e
topology: v6e:2x2x1
jax: 0.10.0
libtpu: 0.0.40
codegen_flags: <defaults>
</compile_context>

<pallas_src>
import jax
import jax.numpy as jnp
from jax.experimental import pallas as pl
from jax.experimental.pallas import tpu as pltpu

P_DROP = 0.1
SCALE = 1.0 / (1.0 - P_DROP)


def dropout_kernel(x_ref, u_ref, o_ref):
    # Keep an element iff its uniform draw >= p; kept elements scaled by 1/(1-p).
    keep = u_ref[...] >= jnp.float32(P_DROP)
    o_ref[...] = jnp.where(keep, x_ref[...] * jnp.float32(SCALE), jnp.float32(0.0))


def dropout_pallas(x, key):
    """x: (B, S, H) float32. Returns dropout(x) with p=0.1 (training mode)."""
    b, s, h = x.shape
    rows, cols = b * s, h
    x2d = x.reshape(rows, cols)

    # TODO(synk): on a pure-TPU deployment, generate the mask in-kernel with
    # pltpu.prng_seed(seed + pl.program_id(0)) / pltpu.prng_random_bits to save
    # this extra HBM read; it is produced host-side here so the kernel also
    # lowers cleanly under interpret mode (where those primitives are missing).
    u = jax.random.uniform(key, (rows, cols), dtype=jnp.float32)

    # 3 row tiles of (128, 768): lane-dense (768 = 6*128), sublane-aligned
    # (128 % 8 == 0), small enough for double-buffering yet few enough tiles
    # that per-step overhead stays negligible.
    tile_rows = 128 if rows % 128 == 0 else rows
    grid = (rows // tile_rows,)

    out2d = pl.pallas_call(
        dropout_kernel,
        out_shape=jax.ShapeDtypeStruct((rows, cols), x2d.dtype),
        grid=grid,
        in_specs=[
            pl.BlockSpec((tile_rows, cols), lambda i: (i, 0)),
            pl.BlockSpec((tile_rows, cols), lambda i: (i, 0)),
        ],
        out_specs=pl.BlockSpec((tile_rows, cols), lambda i: (i, 0)),
        compiler_params=pltpu.CompilerParams(
            dimension_semantics=("parallel",),
        ),
    )(x2d, u)

    return out2d.reshape(b, s, h)


if __name__ == "__main__":
    key = jax.random.PRNGKey(0)
    kx, kmask = jax.random.split(key)
    x319 = jax.random.normal(kx, (1, 384, 768), dtype=jnp.float32)

    x320 = dropout_pallas(x319, kmask)
    x320 = jax.block_until_ready(x320)

    # Light sanity checks: shape/dtype preserved; kept elements scaled by 1/(1-p).
    assert x320.shape == x319.shape and x320.dtype == x319.dtype
    kept = x320 != 0.0
    diff = jnp.abs(jnp.where(kept, x320 - x319 * SCALE, 0.0))
    assert float(jnp.max(diff)) < 1e-5
    drop_frac = 1.0 - float(jnp.mean(kept.astype(jnp.float32)))
    assert 0.05 < drop_frac < 0.15

    print("KERNEL_OK")
</pallas_src>

<mosaic_0001>
module attributes {stable_mosaic.version = 11 : i64} {
  func.func @dropout_kernel(%arg0: i32, %arg1: memref<128x768xf32, #tpu.memory_space<vmem>>, %arg2: memref<128x768xf32, #tpu.memory_space<vmem>>, %arg3: memref<128x768xf32, #tpu.memory_space<vmem>>) attributes {dimension_semantics = [#tpu.dimension_semantics<parallel>], iteration_bounds = array<i64: 3>, scalar_prefetch = 0 : i64, scratch_operands = 0 : i64, tpu.core_type = #tpu.core_type<tc>, window_params = [{transform_indices = @transform_0, window_bounds = array<i64: 128, 768>}, {transform_indices = @transform_1, window_bounds = array<i64: 128, 768>}, {transform_indices = @transform_2, window_bounds = array<i64: 128, 768>}]} {
    %c0 = arith.constant 0 : index
    %c0_0 = arith.constant 0 : index
    %0 = vector.load %arg2[%c0, %c0_0] : memref<128x768xf32, #tpu.memory_space<vmem>>, vector<128x768xf32>
    %cst = arith.constant 1.000000e-01 : f32
    %1 = vector.broadcast %cst : f32 to vector<128x768xf32>
    %2 = arith.cmpf oge, %0, %1 : vector<128x768xf32>
    %c0_1 = arith.constant 0 : index
    %c0_2 = arith.constant 0 : index
    %3 = vector.load %arg1[%c0_1, %c0_2] : memref<128x768xf32, #tpu.memory_space<vmem>>, vector<128x768xf32>
    %cst_3 = arith.constant 1.11111116 : f32
    %4 = vector.broadcast %cst_3 : f32 to vector<128x768xf32>
    %5 = arith.mulf %3, %4 : vector<128x768xf32>
    %cst_4 = arith.constant 0.000000e+00 : f32
    %6 = vector.broadcast %cst_4 : f32 to vector<128x768xf32>
    %7 = arith.select %2, %5, %6 : vector<128x768xi1>, vector<128x768xf32>
    %c0_5 = arith.constant 0 : index
    %c0_6 = arith.constant 0 : index
    %8 = vector.load %arg3[%c0_5, %c0_6] : memref<128x768xf32, #tpu.memory_space<vmem>>, vector<128x768xf32>
    tpu.vector_store %arg3[%c0_5, %c0_6], %7 {strides = array<i32>} : memref<128x768xf32, #tpu.memory_space<vmem>>, vector<128x768xf32>,
    return
  }
  func.func @transform_0(%arg0: i32) -> (i32, i32) {
    %c0_i32 = arith.constant 0 : i32
    %c0_i32_0 = arith.constant 0 : i32
    return %arg0, %c0_i32 : i32, i32
  }
  func.func @transform_1(%arg0: i32) -> (i32, i32) {
    %c0_i32 = arith.constant 0 : i32
    %c0_i32_0 = arith.constant 0 : i32
    return %arg0, %c0_i32 : i32, i32
  }
  func.func @transform_2(%arg0: i32) -> (i32, i32) {
    %c0_i32 = arith.constant 0 : i32
    %c0_i32_0 = arith.constant 0 : i32
    return %arg0, %c0_i32 : i32, i32
  }
}

</mosaic_0001>

<bundles_post_ra>
// kernel: tpu_custom_call.1
= control target key start
LH: loop header
LB: loop body
LE: loop exit
PB: predicated region body
PF: predicated region fallthrough
CT: control target
= control target key end

     0   :  { %7 = vsyncpa [#allocation3], 0  ;;  %s1627_s0 = inlined_call_operand.hbm [shape: f32[384,768], index: 0, kind: input, shape index: {}]   ;;  %s1628_s1 = inlined_call_operand.hbm [shape: f32[384,768], index: 1, kind: input, shape index: {}]   ;;  %s1629_s2 = inlined_call_operand.hbm [shape: f32[384,768], index: 2, kind: output, shape index: {}]  }
   0x1   :  { %9 = vsyncpa [#allocation3 + $0x1], 0 }
   0x2   :  { %10 = vsyncpa [#allocation6], 0 }
   0x3   :  { %12 = vsyncpa [#allocation6 + $0x1], 0 }
   0x4   :  { %13 = vsyncpa [#allocation4], 0 }
   0x5   :  { %15 = vsyncpa [#allocation4 + $0x1], 0  ;;  %s1118_s9 = smov 0   ;;  %s1120_s10 = smov 0  }
   0x6   :  { %s1122_s11 = smov 0   ;;  %s1124_s12 = smov 0  }
   0x7 LB: > { %s1139_s13 = sadd.s32 4294967295, %s1094_s12   ;;  %s894_s14 = sadd.s32 4294967294, %s1094_s12   ;;  %s1094_s12 = sphi %s1124_s12, %s1643_s12   ;;  %s1090_s11 = sphi %s1122_s11, %s1642_s11   ;;  %s1086_s10 = sphi %s1120_s10, %s1641_s10   ;;  %s1082_s9 = sphi %s1118_s9, %s1640_s9  }
   0x8   : > { %s1143_s15 = sadd.s32 1, %s1094_s12   ;;  %s28_s16 = sadd.s32 1, %s1090_s11 }
   0x9   : > { %s25_s17 = ssub.s32 %s1094_s12, %s1143_s15  ;;  %p35_p0 = scmp.ne.s32.totalorder %s1090_s11, %s1086_s10 }
   0xa   : > { %p26_p1 = scmp.eq.s32.totalorder %s25_s17, 0  ;;  %p36_p2 = scmp.eq.s32.totalorder %s1094_s12, 0 }
   0xb   : > { %p41_p3 = scmp.ne.s32.totalorder %s1086_s10, %s1082_s9  ;;  %p42_p4 = scmp.eq.s32.totalorder %s1139_s13, 0 }
   0xc   : > { %s1155_s18 = scalar_select %p26_p1, %s1090_s11, %s28_s16  }
   0xd   : > { %p37_p5 = por %p36_p2, %p35_p0  ;;  %p1157_p6 = por %p42_p4, %p41_p3 }
   0xe   : > { %p91_p7 = scmp.eq.s32.totalorder %s1139_s13, 2  ;;  %p97_p8 = scmp.eq.s32.totalorder %s894_s14, 2 }
   0xf   : > { %s1632_s19 = scalar_select %p1157_p6, 1, 0 }
  0x10   : > { %p932_p9 = scmp.lt.s32.totalorder %s1094_s12, 3  ;;  %p1163_p10 = por %p91_p7, %p35_p0 }
  0x11   : > { %p1167_p11 = por %p97_p8, %p41_p3  ;;  %s1172_s22 = sand.u32 1, %s1090_s11  }
  0x12   : > { %s1633_s20 = scalar_select %p1163_p10, 1, 0 }
  0x13   : > { %s1634_s21 = scalar_select %p1167_p11, 1, 0 }
  0x14   : > { %s910_s23 = smul.u32 12288, %s1094_s12  ;;  %p1183_p12 = pnand %p932_p9, %p37_p5 }
  0x15   : > { %s909_s24 = smul.u32 768, %s1172_s22  ;;  %s118_s3 = scalar_lea.sflag [#allocation3], %s1172_s22 }
  0x16   : > { %s1181_s27 = scalar_lea.hbm %s1627_s0, %s910_s23  ;;  %p972_p0 = pneg %p1183_p12 }
  0x17   : > { %s121_s29 = scalar_lea.vmem [#allocation2], %s909_s24  ;;  %s970_s4 = scalar_lea.hbm %s1181_s27, 12288 }
  0x18   : > { %s129_s30 = sshll.u32 %s121_s29, 4  ;;  %p971_p13 = scmp.ne.s32.totalorder %s1181_s27, %s970_s4  ;;  %s1189_s30 = int_to_ptr.vmem [resolvable:$true] %s129_s30 }
  0x19   : > { %s975_s7 = scalar_lea.hbm %s1627_s0, 36864  ;;  %p976_p3 = scmp.lt.s32.totalorder %s1181_s27, %s1627_s0 }
  0x1a   : > { %p973_p1 = pnand %p972_p0, %p971_p13  ;;  %p977_p4 = scmp.lt.s32.totalorder %s975_s7, %s970_s4 }
  0x1c   : > { %p974_p2 = pneg %p973_p1  ;;  %p978_p5 = por %p977_p4, %p976_p3 }
  0x1e   : > { %p979_p7 = pnand %p978_p5, %p974_p2 }
  0x20   : > { %982 = shalt.err (!%p979_p7)
}
  0x21   : > { %s983_s16 = scalar_lea.vmem %s1189_s30, 12288  ;;  %s1096_s17 = smov [#allocation2]  }
  0x22   : > { %p984_p8 = scmp.ne.s32.totalorder %s1189_s30, %s983_s16  ;;  %s988_s25 = sshll.u32 %s1096_s17, 4  ;;  %s989_s25 = int_to_ptr.vmem [resolvable:$false] %s988_s25 }
  0x23   : > { %s990_s26 = scalar_lea.vmem %s989_s25, 24576  ;;  %p991_p1 = scmp.lt.s32.totalorder %s1189_s30, %s989_s25 }
  0x24   : > { %p986_p9 = pnand %p984_p8, %p972_p0  ;;  %p992_p11 = scmp.lt.s32.totalorder %s990_s26, %s983_s16 }
  0x26   : > { %p987_p13 = pneg %p986_p9  ;;  %p993_p10 = por %p992_p11, %p991_p1 }
  0x28   : > { %p994_p3 = pnand %p993_p10, %p987_p13 }
  0x2a   : > { %997 = shalt.err (!%p994_p3)
}
  0x2b   : > { %s1097_s29 = smov 768   ;;  %s1098_s4 = smov 48  }
  0x2c   : > { %924 = dma.hbm_to_vmem [thread:$0]  (!%p1183_p12), %s1181_s27, 12288, %s1189_s30, %s118_s3, %s1097_s29, %s1097_s29, %s1098_s4  }
  0x2d   : > { %p903_p10 = scmp.ge.s32.totalorder %s1094_s12, 1  ;;  %p159_p11 = scmp.lt.s32.totalorder %s1094_s12, 4 }
  0x2e   : > { %s1232_s8 = scalar_lea.hbm %s1628_s1, %s910_s23  ;;  %s143_s14 = scalar_lea.vmem [#allocation5], %s909_s24 }
  0x2f   : > { %p1223_p2 = pnand %p903_p10, %p159_p11  ;;  %s151_s16 = sshll.u32 %s143_s14, 4  ;;  %s1236_s16 = int_to_ptr.vmem [resolvable:$true] %s151_s16 }
  0x30   : > { %s140_s27 = scalar_lea.sflag [#allocation6], %s1172_s22  ;;  %s998_s30 = scalar_lea.hbm %s1232_s8, 12288 }
  0x31   : > { %p999_p4 = scmp.ne.s32.totalorder %s1232_s8, %s998_s30  ;;  %s1003_s23 = scalar_lea.hbm %s1628_s1, 36864 }
  0x32   : > { %p1004_p8 = scmp.lt.s32.totalorder %s1232_s8, %s1628_s1  ;;  %p1005_p9 = scmp.lt.s32.totalorder %s1003_s23, %s998_s30 }
  0x33   : > { %p1001_p5 = pnand %p999_p4, %p972_p0 }
  0x34   : > { %p1006_p13 = por %p1005_p9, %p1004_p8 }
  0x35   : > { %p1002_p7 = pneg %p1001_p5 }
  0x37   : > { %p1007_p1 = pnand %p1006_p13, %p1002_p7 }
  0x39   : > { %1010 = shalt.err (!%p1007_p1)
}
  0x3a   : > { %s1011_s22 = scalar_lea.vmem %s1236_s16, 12288  ;;  %s1099_s24 = smov [#allocation5]  }
  0x3b   : > { %p1012_p3 = scmp.ne.s32.totalorder %s1236_s16, %s1011_s22  ;;  %s1016_s6 = sshll.u32 %s1099_s24, 4  ;;  %s1017_s6 = int_to_ptr.vmem [resolvable:$false] %s1016_s6 }
  0x3c   : > { %s1018_s7 = scalar_lea.vmem %s1017_s6, 24576  ;;  %p1019_p4 = scmp.lt.s32.totalorder %s1236_s16, %s1017_s6 }
  0x3d   : > { %p1014_p10 = pnand %p1012_p3, %p972_p0  ;;  %p1020_p5 = scmp.lt.s32.totalorder %s1018_s7, %s1011_s22 }
  0x3f   : > { %p1015_p11 = pneg %p1014_p10  ;;  %p1021_p6 = por %p1020_p5, %p1019_p4 }
  0x41   : > { %p1022_p8 = pnand %p1021_p6, %p1015_p11 }
  0x43   : > { %1025 = shalt.err (!%p1022_p8)
}
  0x44   : > { %927 = dma.hbm_to_vmem [thread:$0]  (!%p1183_p12), %s1232_s8, 12288, %s1236_s16, %s140_s27, %s1097_s29, %s1097_s29, %s1098_s4  }
  0x45   : > { %163 = sbr.rel (%p1223_p2) target bundleno = 227 (0xe3), region = 28  ;;  %s1267_s14 = sand.u32 (!%p1223_p2), 1, %s1086_s10  }
  0x46   : > { %s913_s30 = smul.u32 (!%p1223_p2), 768, %s1267_s14  ;;  %s166_s3 = scalar_lea.sflag (!%p1223_p2), [#allocation3], %s1267_s14 }
  0x47   : > { %p1637_p6 = scmp.ne.s32.totalorder (!%p1223_p2), %s1632_s19, 0 }
  0x48   : > { %s1271_s17 = scalar_lea.vmem (!%p1223_p2), [#allocation2], %s913_s30 }
  0x4a   : > { %1069 = dma.done.wait (%p1637_p6), %s166_s3, 12288  }
  0x4b   : > { %1071 = vsyncadd (%p1637_p6), %s166_s3, 4294955008  ;;  %s175_s28 = scalar_lea.sflag [#allocation6], %s1267_s14  ;;  %s1278_s29 = scalar_lea.vmem [#allocation5], %s913_s30 }
  0x4c   : > { %1073 = dma.done.wait (%p1637_p6), %s175_s28, 12288  }
  0x4d   : > { %1075 = vsyncadd (%p1637_p6), %s175_s28, 4294955008  ;;  %v207_v0 = vld [vmem:[%s1278_s29] sm:$0xff]  ;;  %v208_v2 = vld [vmem:[%s1278_s29 + $0x8] sm:$0xff]  ;;  %s914_s4 = smul.u32 12288, %s1139_s13  ;;  %s1291_s19 = scalar_lea.vmem [#allocation7], %s913_s30 }
  0x4e   : > { %v399_v1 = vld [vmem:[%s1271_s17] sm:$0xff]  ;;  %vm303_vm0 = vcmp.ge.f32.partialorder %v207_v0, 0.1  ;;  %vm304_vm1 = vcmp.ge.f32.partialorder %v208_v2, 0.1  ;;  %v400_v4 = vld [vmem:[%s1271_s17 + $0x8] sm:$0xff] }
  0x4f   : > { %v495_v3 = vmul.f32 1.1111112, %v399_v1  ;;  %v209_v5 = vld [vmem:[%s1278_s29 + $0x10] sm:$0xff]  ;;  %s798_s5 = sshll.u32 %s1291_s19, 4  ;;  %v496_v8 = vmul.f32 1.1111112, %v400_v4  ;;  %s1583_s27 = scalar_lea.hbm %s1629_s2, %s914_s4  ;;  %s1575_s5 = int_to_ptr.vmem [resolvable:$true] %s798_s5 }
  0x50   : > { %v401_v6 = vld [vmem:[%s1271_s17 + $0x10] sm:$0xff]  ;;  %vm305_vm2 = vcmp.ge.f32.partialorder %v209_v5, 0.1  ;;  %v210_v9 = vld [vmem:[%s1278_s29 + $0x18] sm:$0xff]  ;;  %v211_v12 = vld [vmem:[%s1278_s29 + $0x20] sm:$0xff]  ;;  %s784_s23 = scalar_lea.sflag [#allocation4], %s1267_s14 }
  0x51   : > { %v591_v7 = vsel %vm303_vm0, %v495_v3, 0.0  ;;  %v497_v10 = vmul.f32 1.1111112, %v401_v6  ;;  %vm306_vm3 = vcmp.ge.f32.partialorder %v210_v9, 0.1  ;;  %v402_v11 = vld [vmem:[%s1271_s17 + $0x18] sm:$0xff] }
  0x52   : > { %687 = vst [vmem:[%s1291_s19] sm:$0xff] %v591_v7  ;;  %v592_v13 = vsel %vm304_vm1, %v496_v8, 0.0  ;;  %v498_v14 = vmul.f32 1.1111112, %v402_v11  ;;  %vm307_vm4 = vcmp.ge.f32.partialorder %v211_v12, 0.1  ;;  %v403_v15 = vld [vmem:[%s1271_s17 + $0x20] sm:$0xff] }
  0x53   : > { %688 = vst [vmem:[%s1291_s19 + $0x8] sm:$0xff] %v592_v13  ;;  %v593_v16 = vsel %vm305_vm2, %v497_v10, 0.0  ;;  %v499_v17 = vmul.f32 1.1111112, %v403_v15  ;;  %v212_v18 = vld [vmem:[%s1278_s29 + $0x28] sm:$0xff]  ;;  %v213_v20 = vld [vmem:[%s1278_s29 + $0x30] sm:$0xff] }
  0x54   : > { %v404_v19 = vld [vmem:[%s1271_s17 + $0x28] sm:$0xff]  ;;  %689 = vst [vmem:[%s1291_s19 + $0x10] sm:$0xff] %v593_v16  ;;  %v594_v21 = vsel %vm306_vm3, %v498_v14, 0.0  ;;  %vm308_vm5 = vcmp.ge.f32.partialorder %v212_v18, 0.1  ;;  %v405_v23 = vld [vmem:[%s1271_s17 + $0x30] sm:$0xff] }
  0x55   : > { %v500_v22 = vmul.f32 1.1111112, %v404_v19  ;;  %690 = vst [vmem:[%s1291_s19 + $0x18] sm:$0xff] %v594_v21  ;;  %v595_v24 = vsel %vm307_vm4, %v499_v17, 0.0  ;;  %vm309_vm6 = vcmp.ge.f32.partialorder %v213_v20, 0.1 }
  0x56   : > { %v501_v25 = vmul.f32 1.1111112, %v405_v23  ;;  %v214_v26 = vld [vmem:[%s1278_s29 + $0x38] sm:$0xff]  ;;  %691 = vst [vmem:[%s1291_s19 + $0x20] sm:$0xff] %v595_v24  ;;  %v215_v29 = vld [vmem:[%s1278_s29 + $0x40] sm:$0xff]  ;;  %v216_v33 = vld [vmem:[%s1278_s29 + $0x48] sm:$0xff] }
  0x57   : > { %v596_v27 = vsel %vm308_vm5, %v500_v22, 0.0  ;;  %vm310_vm7 = vcmp.ge.f32.partialorder %v214_v26, 0.1  ;;  %v406_v28 = vld [vmem:[%s1271_s17 + $0x38] sm:$0xff]  ;;  %v407_v30 = vld [vmem:[%s1271_s17 + $0x40] sm:$0xff]  ;;  %v408_v35 = vld [vmem:[%s1271_s17 + $0x48] sm:$0xff] }
  0x58   : > { %692 = vst [vmem:[%s1291_s19 + $0x28] sm:$0xff] %v596_v27  ;;  %v597_v31 = vsel %vm309_vm6, %v501_v25, 0.0  ;;  %v502_v32 = vmul.f32 1.1111112, %v406_v28  ;;  %vm311_vm8 = vcmp.ge.f32.partialorder %v215_v29, 0.1 }
  0x59   : > { %693 = vst [vmem:[%s1291_s19 + $0x30] sm:$0xff] %v597_v31  ;;  %v503_v34 = vmul.f32 1.1111112, %v407_v30  ;;  %vm312_vm9 = vcmp.ge.f32.partialorder %v216_v33, 0.1  ;;  %v217_v36 = vld [vmem:[%s1278_s29 + $0x50] sm:$0xff] }
  0x5a   : > { %v598_v37 = vsel %vm310_vm7, %v502_v32, 0.0  ;;  %v504_v38 = vmul.f32 1.1111112, %v408_v35  ;;  %vm313_vm10 = vcmp.ge.f32.partialorder %v217_v36, 0.1  ;;  %v409_v39 = vld [vmem:[%s1271_s17 + $0x50] sm:$0xff] }
  0x5b   : > { %694 = vst [vmem:[%s1291_s19 + $0x38] sm:$0xff] %v598_v37  ;;  %v599_v40 = vsel %vm311_vm8, %v503_v34, 0.0  ;;  %v505_v41 = vmul.f32 1.1111112, %v409_v39  ;;  %v218_v42 = vld [vmem:[%s1278_s29 + $0x58] sm:$0xff]  ;;  %v219_v44 = vld [vmem:[%s1278_s29 + $0x60] sm:$0xff] }
  0x5c   : > { %v410_v43 = vld [vmem:[%s1271_s17 + $0x58] sm:$0xff]  ;;  %695 = vst [vmem:[%s1291_s19 + $0x40] sm:$0xff] %v599_v40  ;;  %v600_v45 = vsel %vm312_vm9, %v504_v38, 0.0  ;;  %vm314_vm11 = vcmp.ge.f32.partialorder %v218_v42, 0.1  ;;  %v411_v47 = vld [vmem:[%s1271_s17 + $0x60] sm:$0xff] }
  0x5d   : > { %v506_v46 = vmul.f32 1.1111112, %v410_v43  ;;  %696 = vst [vmem:[%s1291_s19 + $0x48] sm:$0xff] %v600_v45  ;;  %v601_v48 = vsel %vm313_vm10, %v505_v41, 0.0  ;;  %vm315_vm12 = vcmp.ge.f32.partialorder %v219_v44, 0.1 }
  0x5e   : > { %v507_v49 = vmul.f32 1.1111112, %v411_v47  ;;  %v220_v50 = vld [vmem:[%s1278_s29 + $0x68] sm:$0xff]  ;;  %697 = vst [vmem:[%s1291_s19 + $0x50] sm:$0xff] %v601_v48  ;;  %v221_v53 = vld [vmem:[%s1278_s29 + $0x70] sm:$0xff]  ;;  %v222_v57 = vld [vmem:[%s1278_s29 + $0x78] sm:$0xff] }
  0x5f   : > { %v602_v51 = vsel %vm314_vm11, %v506_v46, 0.0  ;;  %vm316_vm13 = vcmp.ge.f32.partialorder %v220_v50, 0.1  ;;  %v412_v52 = vld [vmem:[%s1271_s17 + $0x68] sm:$0xff]  ;;  %v413_v54 = vld [vmem:[%s1271_s17 + $0x70] sm:$0xff]  ;;  %v414_v59 = vld [vmem:[%s1271_s17 + $0x78] sm:$0xff] }
  0x60   : > { %698 = vst [vmem:[%s1291_s19 + $0x58] sm:$0xff] %v602_v51  ;;  %v603_v55 = vsel %vm315_vm12, %v507_v49, 0.0  ;;  %v508_v56 = vmul.f32 1.1111112, %v412_v52  ;;  %vm317_vm14 = vcmp.ge.f32.partialorder %v221_v53, 0.1 }
  0x61   : > { %699 = vst [vmem:[%s1291_s19 + $0x60] sm:$0xff] %v603_v55  ;;  %v509_v58 = vmul.f32 1.1111112, %v413_v54  ;;  %vm318_vm15 = vcmp.ge.f32.partialorder %v222_v57, 0.1  ;;  %v223_v60 = vld [vmem:[%s1278_s29 + $0x80] sm:$0xff] }
  0x62   : > { %v604_v61 = vsel %vm316_vm13, %v508_v56, 0.0  ;;  %v510_v62 = vmul.f32 1.1111112, %v414_v59  ;;  %vm319_vm0 = vcmp.ge.f32.partialorder %v223_v60, 0.1  ;;  %v415_v63 = vld [vmem:[%s1271_s17 + $0x80] sm:$0xff] }
  0x63   : > { %700 = vst [vmem:[%s1291_s19 + $0x68] sm:$0xff] %v604_v61  ;;  %v605_v0 = vsel %vm317_vm14, %v509_v58, 0.0  ;;  %v511_v1 = vmul.f32 1.1111112, %v415_v63  ;;  %v224_v2 = vld [vmem:[%s1278_s29 + $0x88] sm:$0xff]  ;;  %v225_v4 = vld [vmem:[%s1278_s29 + $0x90] sm:$0xff] }
  0x64   : > { %v416_v3 = vld [vmem:[%s1271_s17 + $0x88] sm:$0xff]  ;;  %701 = vst [vmem:[%s1291_s19 + $0x70] sm:$0xff] %v605_v0  ;;  %v606_v5 = vsel %vm318_vm15, %v510_v62, 0.0  ;;  %vm320_vm1 = vcmp.ge.f32.partialorder %v224_v2, 0.1  ;;  %v417_v7 = vld [vmem:[%s1271_s17 + $0x90] sm:$0xff] }
  0x65   : > { %v512_v6 = vmul.f32 1.1111112, %v416_v3  ;;  %702 = vst [vmem:[%s1291_s19 + $0x78] sm:$0xff] %v606_v5  ;;  %v607_v8 = vsel %vm319_vm0, %v511_v1, 0.0  ;;  %vm321_vm2 = vcmp.ge.f32.partialorder %v225_v4, 0.1 }
  0x66   : > { %v513_v9 = vmul.f32 1.1111112, %v417_v7  ;;  %v226_v10 = vld [vmem:[%s1278_s29 + $0x98] sm:$0xff]  ;;  %703 = vst [vmem:[%s1291_s19 + $0x80] sm:$0xff] %v607_v8  ;;  %v227_v13 = vld [vmem:[%s1278_s29 + $0xa0] sm:$0xff]  ;;  %v228_v17 = vld [vmem:[%s1278_s29 + $0xa8] sm:$0xff] }
  0x67   : > { %v608_v11 = vsel %vm320_vm1, %v512_v6, 0.0  ;;  %vm322_vm3 = vcmp.ge.f32.partialorder %v226_v10, 0.1  ;;  %v418_v12 = vld [vmem:[%s1271_s17 + $0x98] sm:$0xff]  ;;  %v419_v14 = vld [vmem:[%s1271_s17 + $0xa0] sm:$0xff]  ;;  %v420_v19 = vld [vmem:[%s1271_s17 + $0xa8] sm:$0xff] }
  0x68   : > { %704 = vst [vmem:[%s1291_s19 + $0x88] sm:$0xff] %v608_v11  ;;  %v609_v15 = vsel %vm321_vm2, %v513_v9, 0.0  ;;  %v514_v16 = vmul.f32 1.1111112, %v418_v12  ;;  %vm323_vm4 = vcmp.ge.f32.partialorder %v227_v13, 0.1 }
  0x69   : > { %705 = vst [vmem:[%s1291_s19 + $0x90] sm:$0xff] %v609_v15  ;;  %v515_v18 = vmul.f32 1.1111112, %v419_v14  ;;  %vm324_vm5 = vcmp.ge.f32.partialorder %v228_v17, 0.1  ;;  %v229_v20 = vld [vmem:[%s1278_s29 + $0xb0] sm:$0xff] }
  0x6a   : > { %v610_v21 = vsel %vm322_vm3, %v514_v16, 0.0  ;;  %v516_v22 = vmul.f32 1.1111112, %v420_v19  ;;  %vm325_vm6 = vcmp.ge.f32.partialorder %v229_v20, 0.1  ;;  %v421_v23 = vld [vmem:[%s1271_s17 + $0xb0] sm:$0xff] }
  0x6b   : > { %706 = vst [vmem:[%s1291_s19 + $0x98] sm:$0xff] %v610_v21  ;;  %v611_v24 = vsel %vm323_vm4, %v515_v18, 0.0  ;;  %v517_v25 = vmul.f32 1.1111112, %v421_v23  ;;  %v230_v26 = vld [vmem:[%s1278_s29 + $0xb8] sm:$0xff]  ;;  %v231_v28 = vld [vmem:[%s1278_s29 + $0xc0] sm:$0xff] }
  0x6c   : > { %v422_v27 = vld [vmem:[%s1271_s17 + $0xb8] sm:$0xff]  ;;  %707 = vst [vmem:[%s1291_s19 + $0xa0] sm:$0xff] %v611_v24  ;;  %v612_v29 = vsel %vm324_vm5, %v516_v22, 0.0  ;;  %vm326_vm7 = vcmp.ge.f32.partialorder %v230_v26, 0.1  ;;  %v423_v31 = vld [vmem:[%s1271_s17 + $0xc0] sm:$0xff] }
  0x6d   : > { %v518_v30 = vmul.f32 1.1111112, %v422_v27  ;;  %708 = vst [vmem:[%s1291_s19 + $0xa8] sm:$0xff] %v612_v29  ;;  %v613_v32 = vsel %vm325_vm6, %v517_v25, 0.0  ;;  %vm327_vm8 = vcmp.ge.f32.partialorder %v231_v28, 0.1 }
  0x6e   : > { %v519_v33 = vmul.f32 1.1111112, %v423_v31  ;;  %v232_v34 = vld [vmem:[%s1278_s29 + $0xc8] sm:$0xff]  ;;  %709 = vst [vmem:[%s1291_s19 + $0xb0] sm:$0xff] %v613_v32  ;;  %v233_v37 = vld [vmem:[%s1278_s29 + $0xd0] sm:$0xff]  ;;  %v234_v41 = vld [vmem:[%s1278_s29 + $0xd8] sm:$0xff] }
  0x6f   : > { %v614_v35 = vsel %vm326_vm7, %v518_v30, 0.0  ;;  %vm328_vm9 = vcmp.ge.f32.partialorder %v232_v34, 0.1  ;;  %v424_v36 = vld [vmem:[%s1271_s17 + $0xc8] sm:$0xff]  ;;  %v425_v38 = vld [vmem:[%s1271_s17 + $0xd0] sm:$0xff]  ;;  %v426_v43 = vld [vmem:[%s1271_s17 + $0xd8] sm:$0xff] }
  0x70   : > { %710 = vst [vmem:[%s1291_s19 + $0xb8] sm:$0xff] %v614_v35  ;;  %v615_v39 = vsel %vm327_vm8, %v519_v33, 0.0  ;;  %v520_v40 = vmul.f32 1.1111112, %v424_v36  ;;  %vm329_vm10 = vcmp.ge.f32.partialorder %v233_v37, 0.1 }
  0x71   : > { %711 = vst [vmem:[%s1291_s19 + $0xc0] sm:$0xff] %v615_v39  ;;  %v521_v42 = vmul.f32 1.1111112, %v425_v38  ;;  %vm330_vm11 = vcmp.ge.f32.partialorder %v234_v41, 0.1  ;;  %v235_v44 = vld [vmem:[%s1278_s29 + $0xe0] sm:$0xff] }
  0x72   : > { %v616_v45 = vsel %vm328_vm9, %v520_v40, 0.0  ;;  %v522_v46 = vmul.f32 1.1111112, %v426_v43  ;;  %vm331_vm12 = vcmp.ge.f32.partialorder %v235_v44, 0.1  ;;  %v427_v47 = vld [vmem:[%s1271_s17 + $0xe0] sm:$0xff] }
  0x73   : > { %712 = vst [vmem:[%s1291_s19 + $0xc8] sm:$0xff] %v616_v45  ;;  %v617_v48 = vsel %vm329_vm10, %v521_v42, 0.0  ;;  %v523_v49 = vmul.f32 1.1111112, %v427_v47  ;;  %v236_v50 = vld [vmem:[%s1278_s29 + $0xe8] sm:$0xff]  ;;  %v237_v52 = vld [vmem:[%s1278_s29 + $0xf0] sm:$0xff] }
  0x74   : > { %v428_v51 = vld [vmem:[%s1271_s17 + $0xe8] sm:$0xff]  ;;  %713 = vst [vmem:[%s1291_s19 + $0xd0] sm:$0xff] %v617_v48  ;;  %v618_v53 = vsel %vm330_vm11, %v522_v46, 0.0  ;;  %vm332_vm13 = vcmp.ge.f32.partialorder %v236_v50, 0.1  ;;  %v429_v55 = vld [vmem:[%s1271_s17 + $0xf0] sm:$0xff] }
  0x75   : > { %v524_v54 = vmul.f32 1.1111112, %v428_v51  ;;  %714 = vst [vmem:[%s1291_s19 + $0xd8] sm:$0xff] %v618_v53  ;;  %v619_v56 = vsel %vm331_vm12, %v523_v49, 0.0  ;;  %vm333_vm14 = vcmp.ge.f32.partialorder %v237_v52, 0.1 }
  0x76   : > { %v525_v57 = vmul.f32 1.1111112, %v429_v55  ;;  %v238_v58 = vld [vmem:[%s1278_s29 + $0xf8] sm:$0xff]  ;;  %715 = vst [vmem:[%s1291_s19 + $0xe0] sm:$0xff] %v619_v56  ;;  %v239_v61 = vld [vmem:[%s1278_s29 + $0x100] sm:$0xff]  ;;  %v240_v1 = vld [vmem:[%s1278_s29 + $0x108] sm:$0xff] }
  0x77   : > { %v620_v59 = vsel %vm332_vm13, %v524_v54, 0.0  ;;  %vm334_vm15 = vcmp.ge.f32.partialorder %v238_v58, 0.1  ;;  %v430_v60 = vld [vmem:[%s1271_s17 + $0xf8] sm:$0xff]  ;;  %v431_v62 = vld [vmem:[%s1271_s17 + $0x100] sm:$0xff]  ;;  %v432_v3 = vld [vmem:[%s1271_s17 + $0x108] sm:$0xff] }
  0x78   : > { %716 = vst [vmem:[%s1291_s19 + $0xe8] sm:$0xff] %v620_v59  ;;  %v621_v63 = vsel %vm333_vm14, %v525_v57, 0.0  ;;  %v526_v0 = vmul.f32 1.1111112, %v430_v60  ;;  %vm335_vm0 = vcmp.ge.f32.partialorder %v239_v61, 0.1 }
  0x79   : > { %717 = vst [vmem:[%s1291_s19 + $0xf0] sm:$0xff] %v621_v63  ;;  %v527_v2 = vmul.f32 1.1111112, %v431_v62  ;;  %vm336_vm1 = vcmp.ge.f32.partialorder %v240_v1, 0.1  ;;  %v241_v4 = vld [vmem:[%s1278_s29 + $0x110] sm:$0xff] }
  0x7a   : > { %v622_v5 = vsel %vm334_vm15, %v526_v0, 0.0  ;;  %v528_v6 = vmul.f32 1.1111112, %v432_v3  ;;  %vm337_vm2 = vcmp.ge.f32.partialorder %v241_v4, 0.1  ;;  %v433_v7 = vld [vmem:[%s1271_s17 + $0x110] sm:$0xff] }
  0x7b   : > { %718 = vst [vmem:[%s1291_s19 + $0xf8] sm:$0xff] %v622_v5  ;;  %v623_v8 = vsel %vm335_vm0, %v527_v2, 0.0  ;;  %v529_v9 = vmul.f32 1.1111112, %v433_v7  ;;  %v242_v10 = vld [vmem:[%s1278_s29 + $0x118] sm:$0xff]  ;;  %v243_v12 = vld [vmem:[%s1278_s29 + $0x120] sm:$0xff] }
  0x7c   : > { %v434_v11 = vld [vmem:[%s1271_s17 + $0x118] sm:$0xff]  ;;  %719 = vst [vmem:[%s1291_s19 + $0x100] sm:$0xff] %v623_v8  ;;  %v624_v13 = vsel %vm336_vm1, %v528_v6, 0.0  ;;  %vm338_vm3 = vcmp.ge.f32.partialorder %v242_v10, 0.1  ;;  %v435_v15 = vld [vmem:[%s1271_s17 + $0x120] sm:$0xff] }
  0x7d   : > { %v530_v14 = vmul.f32 1.1111112, %v434_v11  ;;  %720 = vst [vmem:[%s1291_s19 + $0x108] sm:$0xff] %v624_v13  ;;  %v625_v16 = vsel %vm337_vm2, %v529_v9, 0.0  ;;  %vm339_vm4 = vcmp.ge.f32.partialorder %v243_v12, 0.1 }
  0x7e   : > { %v531_v17 = vmul.f32 1.1111112, %v435_v15  ;;  %v244_v18 = vld [vmem:[%s1278_s29 + $0x128] sm:$0xff]  ;;  %721 = vst [vmem:[%s1291_s19 + $0x110] sm:$0xff] %v625_v16  ;;  %v245_v21 = vld [vmem:[%s1278_s29 + $0x130] sm:$0xff]  ;;  %v246_v25 = vld [vmem:[%s1278_s29 + $0x138] sm:$0xff] }
  0x7f   : > { %v626_v19 = vsel %vm338_vm3, %v530_v14, 0.0  ;;  %vm340_vm5 = vcmp.ge.f32.partialorder %v244_v18, 0.1  ;;  %v436_v20 = vld [vmem:[%s1271_s17 + $0x128] sm:$0xff]  ;;  %v437_v22 = vld [vmem:[%s1271_s17 + $0x130] sm:$0xff]  ;;  %v438_v27 = vld [vmem:[%s1271_s17 + $0x138] sm:$0xff] }
  0x80   : > { %722 = vst [vmem:[%s1291_s19 + $0x118] sm:$0xff] %v626_v19  ;;  %v627_v23 = vsel %vm339_vm4, %v531_v17, 0.0  ;;  %v532_v24 = vmul.f32 1.1111112, %v436_v20  ;;  %vm341_vm6 = vcmp.ge.f32.partialorder %v245_v21, 0.1 }
  0x81   : > { %723 = vst [vmem:[%s1291_s19 + $0x120] sm:$0xff] %v627_v23  ;;  %v533_v26 = vmul.f32 1.1111112, %v437_v22  ;;  %vm342_vm7 = vcmp.ge.f32.partialorder %v246_v25, 0.1  ;;  %v247_v28 = vld [vmem:[%s1278_s29 + $0x140] sm:$0xff] }
  0x82   : > { %v628_v29 = vsel %vm340_vm5, %v532_v24, 0.0  ;;  %v534_v30 = vmul.f32 1.1111112, %v438_v27  ;;  %vm343_vm8 = vcmp.ge.f32.partialorder %v247_v28, 0.1  ;;  %v439_v31 = vld [vmem:[%s1271_s17 + $0x140] sm:$0xff] }
  0x83   : > { %724 = vst [vmem:[%s1291_s19 + $0x128] sm:$0xff] %v628_v29  ;;  %v629_v32 = vsel %vm341_vm6, %v533_v26, 0.0  ;;  %v535_v33 = vmul.f32 1.1111112, %v439_v31  ;;  %v248_v34 = vld [vmem:[%s1278_s29 + $0x148] sm:$0xff]  ;;  %v249_v36 = vld [vmem:[%s1278_s29 + $0x150] sm:$0xff] }
  0x84   : > { %v440_v35 = vld [vmem:[%s1271_s17 + $0x148] sm:$0xff]  ;;  %725 = vst [vmem:[%s1291_s19 + $0x130] sm:$0xff] %v629_v32  ;;  %v630_v37 = vsel %vm342_vm7, %v534_v30, 0.0  ;;  %vm344_vm9 = vcmp.ge.f32.partialorder %v248_v34, 0.1  ;;  %v441_v39 = vld [vmem:[%s1271_s17 + $0x150] sm:$0xff] }
  0x85   : > { %v536_v38 = vmul.f32 1.1111112, %v440_v35  ;;  %726 = vst [vmem:[%s1291_s19 + $0x138] sm:$0xff] %v630_v37  ;;  %v631_v40 = vsel %vm343_vm8, %v535_v33, 0.0  ;;  %vm345_vm10 = vcmp.ge.f32.partialorder %v249_v36, 0.1 }
  0x86   : > { %v537_v41 = vmul.f32 1.1111112, %v441_v39  ;;  %v250_v42 = vld [vmem:[%s1278_s29 + $0x158] sm:$0xff]  ;;  %727 = vst [vmem:[%s1291_s19 + $0x140] sm:$0xff] %v631_v40  ;;  %v251_v45 = vld [vmem:[%s1278_s29 + $0x160] sm:$0xff]  ;;  %v252_v49 = vld [vmem:[%s1278_s29 + $0x168] sm:$0xff] }
  0x87   : > { %v632_v43 = vsel %vm344_vm9, %v536_v38, 0.0  ;;  %vm346_vm11 = vcmp.ge.f32.partialorder %v250_v42, 0.1  ;;  %v442_v44 = vld [vmem:[%s1271_s17 + $0x158] sm:$0xff]  ;;  %v443_v46 = vld [vmem:[%s1271_s17 + $0x160] sm:$0xff]  ;;  %v444_v51 = vld [vmem:[%s1271_s17 + $0x168] sm:$0xff] }
  0x88   : > { %728 = vst [vmem:[%s1291_s19 + $0x148] sm:$0xff] %v632_v43  ;;  %v633_v47 = vsel %vm345_vm10, %v537_v41, 0.0  ;;  %v538_v48 = vmul.f32 1.1111112, %v442_v44  ;;  %vm347_vm12 = vcmp.ge.f32.partialorder %v251_v45, 0.1 }
  0x89   : > { %729 = vst [vmem:[%s1291_s19 + $0x150] sm:$0xff] %v633_v47  ;;  %v539_v50 = vmul.f32 1.1111112, %v443_v46  ;;  %vm348_vm13 = vcmp.ge.f32.partialorder %v252_v49, 0.1  ;;  %v253_v52 = vld [vmem:[%s1278_s29 + $0x170] sm:$0xff] }
  0x8a   : > { %v634_v53 = vsel %vm346_vm11, %v538_v48, 0.0  ;;  %v540_v54 = vmul.f32 1.1111112, %v444_v51  ;;  %vm349_vm14 = vcmp.ge.f32.partialorder %v253_v52, 0.1  ;;  %v445_v55 = vld [vmem:[%s1271_s17 + $0x170] sm:$0xff] }
  0x8b   : > { %730 = vst [vmem:[%s1291_s19 + $0x158] sm:$0xff] %v634_v53  ;;  %v635_v56 = vsel %vm347_vm12, %v539_v50, 0.0  ;;  %v541_v57 = vmul.f32 1.1111112, %v445_v55  ;;  %v254_v58 = vld [vmem:[%s1278_s29 + $0x178] sm:$0xff]  ;;  %v255_v60 = vld [vmem:[%s1278_s29 + $0x180] sm:$0xff] }
  0x8c   : > { %v446_v59 = vld [vmem:[%s1271_s17 + $0x178] sm:$0xff]  ;;  %731 = vst [vmem:[%s1291_s19 + $0x160] sm:$0xff] %v635_v56  ;;  %v636_v61 = vsel %vm348_vm13, %v540_v54, 0.0  ;;  %vm350_vm15 = vcmp.ge.f32.partialorder %v254_v58, 0.1  ;;  %v447_v63 = vld [vmem:[%s1271_s17 + $0x180] sm:$0xff] }
  0x8d   : > { %v542_v62 = vmul.f32 1.1111112, %v446_v59  ;;  %732 = vst [vmem:[%s1291_s19 + $0x168] sm:$0xff] %v636_v61  ;;  %v637_v0 = vsel %vm349_vm14, %v541_v57, 0.0  ;;  %vm351_vm0 = vcmp.ge.f32.partialorder %v255_v60, 0.1 }
  0x8e   : > { %v543_v1 = vmul.f32 1.1111112, %v447_v63  ;;  %v256_v2 = vld [vmem:[%s1278_s29 + $0x188] sm:$0xff]  ;;  %733 = vst [vmem:[%s1291_s19 + $0x170] sm:$0xff] %v637_v0  ;;  %v257_v5 = vld [vmem:[%s1278_s29 + $0x190] sm:$0xff]  ;;  %v258_v9 = vld [vmem:[%s1278_s29 + $0x198] sm:$0xff] }
  0x8f   : > { %v638_v3 = vsel %vm350_vm15, %v542_v62, 0.0  ;;  %vm352_vm1 = vcmp.ge.f32.partialorder %v256_v2, 0.1  ;;  %v448_v4 = vld [vmem:[%s1271_s17 + $0x188] sm:$0xff]  ;;  %v449_v6 = vld [vmem:[%s1271_s17 + $0x190] sm:$0xff]  ;;  %v450_v11 = vld [vmem:[%s1271_s17 + $0x198] sm:$0xff] }
  0x90   : > { %734 = vst [vmem:[%s1291_s19 + $0x178] sm:$0xff] %v638_v3  ;;  %v639_v7 = vsel %vm351_vm0, %v543_v1, 0.0  ;;  %v544_v8 = vmul.f32 1.1111112, %v448_v4  ;;  %vm353_vm2 = vcmp.ge.f32.partialorder %v257_v5, 0.1 }
  0x91   : > { %735 = vst [vmem:[%s1291_s19 + $0x180] sm:$0xff] %v639_v7  ;;  %v545_v10 = vmul.f32 1.1111112, %v449_v6  ;;  %vm354_vm3 = vcmp.ge.f32.partialorder %v258_v9, 0.1  ;;  %v259_v12 = vld [vmem:[%s1278_s29 + $0x1a0] sm:$0xff] }
  0x92   : > { %v640_v13 = vsel %vm352_vm1, %v544_v8, 0.0  ;;  %v546_v14 = vmul.f32 1.1111112, %v450_v11  ;;  %vm355_vm4 = vcmp.ge.f32.partialorder %v259_v12, 0.1  ;;  %v451_v15 = vld [vmem:[%s1271_s17 + $0x1a0] sm:$0xff] }
  0x93   : > { %736 = vst [vmem:[%s1291_s19 + $0x188] sm:$0xff] %v640_v13  ;;  %v641_v16 = vsel %vm353_vm2, %v545_v10, 0.0  ;;  %v547_v17 = vmul.f32 1.1111112, %v451_v15  ;;  %v260_v18 = vld [vmem:[%s1278_s29 + $0x1a8] sm:$0xff]  ;;  %v261_v20 = vld [vmem:[%s1278_s29 + $0x1b0] sm:$0xff] }
  0x94   : > { %v452_v19 = vld [vmem:[%s1271_s17 + $0x1a8] sm:$0xff]  ;;  %737 = vst [vmem:[%s1291_s19 + $0x190] sm:$0xff] %v641_v16  ;;  %v642_v21 = vsel %vm354_vm3, %v546_v14, 0.0  ;;  %vm356_vm5 = vcmp.ge.f32.partialorder %v260_v18, 0.1  ;;  %v453_v23 = vld [vmem:[%s1271_s17 + $0x1b0] sm:$0xff] }
  0x95   : > { %v548_v22 = vmul.f32 1.1111112, %v452_v19  ;;  %738 = vst [vmem:[%s1291_s19 + $0x198] sm:$0xff] %v642_v21  ;;  %v643_v24 = vsel %vm355_vm4, %v547_v17, 0.0  ;;  %vm357_vm6 = vcmp.ge.f32.partialorder %v261_v20, 0.1 }
  0x96   : > { %v549_v25 = vmul.f32 1.1111112, %v453_v23  ;;  %v262_v26 = vld [vmem:[%s1278_s29 + $0x1b8] sm:$0xff]  ;;  %739 = vst [vmem:[%s1291_s19 + $0x1a0] sm:$0xff] %v643_v24  ;;  %v263_v29 = vld [vmem:[%s1278_s29 + $0x1c0] sm:$0xff]  ;;  %v264_v33 = vld [vmem:[%s1278_s29 + $0x1c8] sm:$0xff] }
  0x97   : > { %v644_v27 = vsel %vm356_vm5, %v548_v22, 0.0  ;;  %vm358_vm7 = vcmp.ge.f32.partialorder %v262_v26, 0.1  ;;  %v454_v28 = vld [vmem:[%s1271_s17 + $0x1b8] sm:$0xff]  ;;  %v455_v30 = vld [vmem:[%s1271_s17 + $0x1c0] sm:$0xff]  ;;  %v456_v35 = vld [vmem:[%s1271_s17 + $0x1c8] sm:$0xff] }
  0x98   : > { %740 = vst [vmem:[%s1291_s19 + $0x1a8] sm:$0xff] %v644_v27  ;;  %v645_v31 = vsel %vm357_vm6, %v549_v25, 0.0  ;;  %v550_v32 = vmul.f32 1.1111112, %v454_v28  ;;  %vm359_vm8 = vcmp.ge.f32.partialorder %v263_v29, 0.1 }
  0x99   : > { %741 = vst [vmem:[%s1291_s19 + $0x1b0] sm:$0xff] %v645_v31  ;;  %v551_v34 = vmul.f32 1.1111112, %v455_v30  ;;  %vm360_vm9 = vcmp.ge.f32.partialorder %v264_v33, 0.1  ;;  %v265_v36 = vld [vmem:[%s1278_s29 + $0x1d0] sm:$0xff] }
  0x9a   : > { %v646_v37 = vsel %vm358_vm7, %v550_v32, 0.0  ;;  %v552_v38 = vmul.f32 1.1111112, %v456_v35  ;;  %vm361_vm10 = vcmp.ge.f32.partialorder %v265_v36, 0.1  ;;  %v457_v39 = vld [vmem:[%s1271_s17 + $0x1d0] sm:$0xff] }
  0x9b   : > { %742 = vst [vmem:[%s1291_s19 + $0x1b8] sm:$0xff] %v646_v37  ;;  %v647_v40 = vsel %vm359_vm8, %v551_v34, 0.0  ;;  %v553_v41 = vmul.f32 1.1111112, %v457_v39  ;;  %v266_v42 = vld [vmem:[%s1278_s29 + $0x1d8] sm:$0xff]  ;;  %v267_v44 = vld [vmem:[%s1278_s29 + $0x1e0] sm:$0xff] }
  0x9c   : > { %v458_v43 = vld [vmem:[%s1271_s17 + $0x1d8] sm:$0xff]  ;;  %743 = vst [vmem:[%s1291_s19 + $0x1c0] sm:$0xff] %v647_v40  ;;  %v648_v45 = vsel %vm360_vm9, %v552_v38, 0.0  ;;  %vm362_vm11 = vcmp.ge.f32.partialorder %v266_v42, 0.1  ;;  %v459_v47 = vld [vmem:[%s1271_s17 + $0x1e0] sm:$0xff] }
  0x9d   : > { %v554_v46 = vmul.f32 1.1111112, %v458_v43  ;;  %744 = vst [vmem:[%s1291_s19 + $0x1c8] sm:$0xff] %v648_v45  ;;  %v649_v48 = vsel %vm361_vm10, %v553_v41, 0.0  ;;  %vm363_vm12 = vcmp.ge.f32.partialorder %v267_v44, 0.1 }
  0x9e   : > { %v555_v49 = vmul.f32 1.1111112, %v459_v47  ;;  %v268_v50 = vld [vmem:[%s1278_s29 + $0x1e8] sm:$0xff]  ;;  %745 = vst [vmem:[%s1291_s19 + $0x1d0] sm:$0xff] %v649_v48  ;;  %v269_v53 = vld [vmem:[%s1278_s29 + $0x1f0] sm:$0xff]  ;;  %v270_v57 = vld [vmem:[%s1278_s29 + $0x1f8] sm:$0xff] }
  0x9f   : > { %v650_v51 = vsel %vm362_vm11, %v554_v46, 0.0  ;;  %vm364_vm13 = vcmp.ge.f32.partialorder %v268_v50, 0.1  ;;  %v460_v52 = vld [vmem:[%s1271_s17 + $0x1e8] sm:$0xff]  ;;  %v461_v54 = vld [vmem:[%s1271_s17 + $0x1f0] sm:$0xff]  ;;  %v462_v59 = vld [vmem:[%s1271_s17 + $0x1f8] sm:$0xff] }
  0xa0   : > { %746 = vst [vmem:[%s1291_s19 + $0x1d8] sm:$0xff] %v650_v51  ;;  %v651_v55 = vsel %vm363_vm12, %v555_v49, 0.0  ;;  %v556_v56 = vmul.f32 1.1111112, %v460_v52  ;;  %vm365_vm14 = vcmp.ge.f32.partialorder %v269_v53, 0.1 }
  0xa1   : > { %747 = vst [vmem:[%s1291_s19 + $0x1e0] sm:$0xff] %v651_v55  ;;  %v557_v58 = vmul.f32 1.1111112, %v461_v54  ;;  %vm366_vm15 = vcmp.ge.f32.partialorder %v270_v57, 0.1  ;;  %v271_v60 = vld [vmem:[%s1278_s29 + $0x200] sm:$0xff] }
  0xa2   : > { %v652_v61 = vsel %vm364_vm13, %v556_v56, 0.0  ;;  %v558_v62 = vmul.f32 1.1111112, %v462_v59  ;;  %vm367_vm0 = vcmp.ge.f32.partialorder %v271_v60, 0.1  ;;  %v463_v63 = vld [vmem:[%s1271_s17 + $0x200] sm:$0xff] }
  0xa3   : > { %748 = vst [vmem:[%s1291_s19 + $0x1e8] sm:$0xff] %v652_v61  ;;  %v653_v0 = vsel %vm365_vm14, %v557_v58, 0.0  ;;  %v559_v1 = vmul.f32 1.1111112, %v463_v63  ;;  %v272_v2 = vld [vmem:[%s1278_s29 + $0x208] sm:$0xff]  ;;  %v273_v4 = vld [vmem:[%s1278_s29 + $0x210] sm:$0xff] }
  0xa4   : > { %v464_v3 = vld [vmem:[%s1271_s17 + $0x208] sm:$0xff]  ;;  %749 = vst [vmem:[%s1291_s19 + $0x1f0] sm:$0xff] %v653_v0  ;;  %v654_v5 = vsel %vm366_vm15, %v558_v62, 0.0  ;;  %vm368_vm1 = vcmp.ge.f32.partialorder %v272_v2, 0.1  ;;  %v465_v7 = vld [vmem:[%s1271_s17 + $0x210] sm:$0xff] }
  0xa5   : > { %v560_v6 = vmul.f32 1.1111112, %v464_v3  ;;  %750 = vst [vmem:[%s1291_s19 + $0x1f8] sm:$0xff] %v654_v5  ;;  %v655_v8 = vsel %vm367_vm0, %v559_v1, 0.0  ;;  %vm369_vm2 = vcmp.ge.f32.partialorder %v273_v4, 0.1 }
  0xa6   : > { %v561_v9 = vmul.f32 1.1111112, %v465_v7  ;;  %v274_v10 = vld [vmem:[%s1278_s29 + $0x218] sm:$0xff]  ;;  %751 = vst [vmem:[%s1291_s19 + $0x200] sm:$0xff] %v655_v8  ;;  %v275_v13 = vld [vmem:[%s1278_s29 + $0x220] sm:$0xff]  ;;  %v276_v17 = vld [vmem:[%s1278_s29 + $0x228] sm:$0xff] }
  0xa7   : > { %v656_v11 = vsel %vm368_vm1, %v560_v6, 0.0  ;;  %vm370_vm3 = vcmp.ge.f32.partialorder %v274_v10, 0.1  ;;  %v466_v12 = vld [vmem:[%s1271_s17 + $0x218] sm:$0xff]  ;;  %v467_v14 = vld [vmem:[%s1271_s17 + $0x220] sm:$0xff]  ;;  %v468_v19 = vld [vmem:[%s1271_s17 + $0x228] sm:$0xff] }
  0xa8   : > { %752 = vst [vmem:[%s1291_s19 + $0x208] sm:$0xff] %v656_v11  ;;  %v657_v15 = vsel %vm369_vm2, %v561_v9, 0.0  ;;  %v562_v16 = vmul.f32 1.1111112, %v466_v12  ;;  %vm371_vm4 = vcmp.ge.f32.partialorder %v275_v13, 0.1 }
  0xa9   : > { %753 = vst [vmem:[%s1291_s19 + $0x210] sm:$0xff] %v657_v15  ;;  %v563_v18 = vmul.f32 1.1111112, %v467_v14  ;;  %vm372_vm5 = vcmp.ge.f32.partialorder %v276_v17, 0.1  ;;  %v277_v20 = vld [vmem:[%s1278_s29 + $0x230] sm:$0xff] }
  0xaa   : > { %v658_v21 = vsel %vm370_vm3, %v562_v16, 0.0  ;;  %v564_v22 = vmul.f32 1.1111112, %v468_v19  ;;  %vm373_vm6 = vcmp.ge.f32.partialorder %v277_v20, 0.1  ;;  %v469_v23 = vld [vmem:[%s1271_s17 + $0x230] sm:$0xff] }
  0xab   : > { %754 = vst [vmem:[%s1291_s19 + $0x218] sm:$0xff] %v658_v21  ;;  %v659_v24 = vsel %vm371_vm4, %v563_v18, 0.0  ;;  %v565_v25 = vmul.f32 1.1111112, %v469_v23  ;;  %v278_v26 = vld [vmem:[%s1278_s29 + $0x238] sm:$0xff]  ;;  %v279_v28 = vld [vmem:[%s1278_s29 + $0x240] sm:$0xff] }
  0xac   : > { %v470_v27 = vld [vmem:[%s1271_s17 + $0x238] sm:$0xff]  ;;  %755 = vst [vmem:[%s1291_s19 + $0x220] sm:$0xff] %v659_v24  ;;  %v660_v29 = vsel %vm372_vm5, %v564_v22, 0.0  ;;  %vm374_vm7 = vcmp.ge.f32.partialorder %v278_v26, 0.1  ;;  %v471_v31 = vld [vmem:[%s1271_s17 + $0x240] sm:$0xff] }
  0xad   : > { %v566_v30 = vmul.f32 1.1111112, %v470_v27  ;;  %756 = vst [vmem:[%s1291_s19 + $0x228] sm:$0xff] %v660_v29  ;;  %v661_v32 = vsel %vm373_vm6, %v565_v25, 0.0  ;;  %vm375_vm8 = vcmp.ge.f32.partialorder %v279_v28, 0.1 }
  0xae   : > { %v567_v33 = vmul.f32 1.1111112, %v471_v31  ;;  %v280_v34 = vld [vmem:[%s1278_s29 + $0x248] sm:$0xff]  ;;  %757 = vst [vmem:[%s1291_s19 + $0x230] sm:$0xff] %v661_v32  ;;  %v281_v37 = vld [vmem:[%s1278_s29 + $0x250] sm:$0xff]  ;;  %v282_v41 = vld [vmem:[%s1278_s29 + $0x258] sm:$0xff] }
  0xaf   : > { %v662_v35 = vsel %vm374_vm7, %v566_v30, 0.0  ;;  %vm376_vm9 = vcmp.ge.f32.partialorder %v280_v34, 0.1  ;;  %v472_v36 = vld [vmem:[%s1271_s17 + $0x248] sm:$0xff]  ;;  %v473_v38 = vld [vmem:[%s1271_s17 + $0x250] sm:$0xff]  ;;  %v474_v43 = vld [vmem:[%s1271_s17 + $0x258] sm:$0xff] }
  0xb0   : > { %758 = vst [vmem:[%s1291_s19 + $0x238] sm:$0xff] %v662_v35  ;;  %v663_v39 = vsel %vm375_vm8, %v567_v33, 0.0  ;;  %v568_v40 = vmul.f32 1.1111112, %v472_v36  ;;  %vm377_vm10 = vcmp.ge.f32.partialorder %v281_v37, 0.1 }
  0xb1   : > { %759 = vst [vmem:[%s1291_s19 + $0x240] sm:$0xff] %v663_v39  ;;  %v569_v42 = vmul.f32 1.1111112, %v473_v38  ;;  %vm378_vm11 = vcmp.ge.f32.partialorder %v282_v41, 0.1  ;;  %v283_v44 = vld [vmem:[%s1278_s29 + $0x260] sm:$0xff] }
  0xb2   : > { %v664_v45 = vsel %vm376_vm9, %v568_v40, 0.0  ;;  %v570_v46 = vmul.f32 1.1111112, %v474_v43  ;;  %vm379_vm12 = vcmp.ge.f32.partialorder %v283_v44, 0.1  ;;  %v475_v47 = vld [vmem:[%s1271_s17 + $0x260] sm:$0xff] }
  0xb3   : > { %760 = vst [vmem:[%s1291_s19 + $0x248] sm:$0xff] %v664_v45  ;;  %v665_v48 = vsel %vm377_vm10, %v569_v42, 0.0  ;;  %v571_v49 = vmul.f32 1.1111112, %v475_v47  ;;  %v284_v50 = vld [vmem:[%s1278_s29 + $0x268] sm:$0xff]  ;;  %v285_v52 = vld [vmem:[%s1278_s29 + $0x270] sm:$0xff] }
  0xb4   : > { %v476_v51 = vld [vmem:[%s1271_s17 + $0x268] sm:$0xff]  ;;  %761 = vst [vmem:[%s1291_s19 + $0x250] sm:$0xff] %v665_v48  ;;  %v666_v53 = vsel %vm378_vm11, %v570_v46, 0.0  ;;  %vm380_vm13 = vcmp.ge.f32.partialorder %v284_v50, 0.1  ;;  %v477_v55 = vld [vmem:[%s1271_s17 + $0x270] sm:$0xff] }
  0xb5   : > { %v572_v54 = vmul.f32 1.1111112, %v476_v51  ;;  %762 = vst [vmem:[%s1291_s19 + $0x258] sm:$0xff] %v666_v53  ;;  %v667_v56 = vsel %vm379_vm12, %v571_v49, 0.0  ;;  %vm381_vm14 = vcmp.ge.f32.partialorder %v285_v52, 0.1 }
  0xb6   : > { %v573_v57 = vmul.f32 1.1111112, %v477_v55  ;;  %v286_v58 = vld [vmem:[%s1278_s29 + $0x278] sm:$0xff]  ;;  %763 = vst [vmem:[%s1291_s19 + $0x260] sm:$0xff] %v667_v56  ;;  %v287_v61 = vld [vmem:[%s1278_s29 + $0x280] sm:$0xff]  ;;  %v288_v1 = vld [vmem:[%s1278_s29 + $0x288] sm:$0xff] }
  0xb7   : > { %v668_v59 = vsel %vm380_vm13, %v572_v54, 0.0  ;;  %vm382_vm15 = vcmp.ge.f32.partialorder %v286_v58, 0.1  ;;  %v478_v60 = vld [vmem:[%s1271_s17 + $0x278] sm:$0xff]  ;;  %v479_v62 = vld [vmem:[%s1271_s17 + $0x280] sm:$0xff]  ;;  %v480_v3 = vld [vmem:[%s1271_s17 + $0x288] sm:$0xff] }
  0xb8   : > { %764 = vst [vmem:[%s1291_s19 + $0x268] sm:$0xff] %v668_v59  ;;  %v669_v63 = vsel %vm381_vm14, %v573_v57, 0.0  ;;  %v574_v0 = vmul.f32 1.1111112, %v478_v60  ;;  %vm383_vm0 = vcmp.ge.f32.partialorder %v287_v61, 0.1 }
  0xb9   : > { %765 = vst [vmem:[%s1291_s19 + $0x270] sm:$0xff] %v669_v63  ;;  %v575_v2 = vmul.f32 1.1111112, %v479_v62  ;;  %vm384_vm1 = vcmp.ge.f32.partialorder %v288_v1, 0.1  ;;  %v289_v4 = vld [vmem:[%s1278_s29 + $0x290] sm:$0xff] }
  0xba   : > { %v670_v5 = vsel %vm382_vm15, %v574_v0, 0.0  ;;  %v576_v6 = vmul.f32 1.1111112, %v480_v3  ;;  %vm385_vm2 = vcmp.ge.f32.partialorder %v289_v4, 0.1  ;;  %v481_v7 = vld [vmem:[%s1271_s17 + $0x290] sm:$0xff] }
  0xbb   : > { %766 = vst [vmem:[%s1291_s19 + $0x278] sm:$0xff] %v670_v5  ;;  %v671_v8 = vsel %vm383_vm0, %v575_v2, 0.0  ;;  %v577_v9 = vmul.f32 1.1111112, %v481_v7  ;;  %v290_v10 = vld [vmem:[%s1278_s29 + $0x298] sm:$0xff]  ;;  %v291_v12 = vld [vmem:[%s1278_s29 + $0x2a0] sm:$0xff] }
  0xbc   : > { %v482_v11 = vld [vmem:[%s1271_s17 + $0x298] sm:$0xff]  ;;  %767 = vst [vmem:[%s1291_s19 + $0x280] sm:$0xff] %v671_v8  ;;  %v672_v13 = vsel %vm384_vm1, %v576_v6, 0.0  ;;  %vm386_vm3 = vcmp.ge.f32.partialorder %v290_v10, 0.1  ;;  %v483_v15 = vld [vmem:[%s1271_s17 + $0x2a0] sm:$0xff] }
  0xbd   : > { %v578_v14 = vmul.f32 1.1111112, %v482_v11  ;;  %768 = vst [vmem:[%s1291_s19 + $0x288] sm:$0xff] %v672_v13  ;;  %v673_v16 = vsel %vm385_vm2, %v577_v9, 0.0  ;;  %vm387_vm4 = vcmp.ge.f32.partialorder %v291_v12, 0.1 }
  0xbe   : > { %v579_v17 = vmul.f32 1.1111112, %v483_v15  ;;  %v292_v18 = vld [vmem:[%s1278_s29 + $0x2a8] sm:$0xff]  ;;  %769 = vst [vmem:[%s1291_s19 + $0x290] sm:$0xff] %v673_v16  ;;  %v293_v21 = vld [vmem:[%s1278_s29 + $0x2b0] sm:$0xff]  ;;  %v294_v25 = vld [vmem:[%s1278_s29 + $0x2b8] sm:$0xff] }
  0xbf   : > { %v674_v19 = vsel %vm386_vm3, %v578_v14, 0.0  ;;  %vm388_vm5 = vcmp.ge.f32.partialorder %v292_v18, 0.1  ;;  %v484_v20 = vld [vmem:[%s1271_s17 + $0x2a8] sm:$0xff]  ;;  %v485_v22 = vld [vmem:[%s1271_s17 + $0x2b0] sm:$0xff]  ;;  %v486_v27 = vld [vmem:[%s1271_s17 + $0x2b8] sm:$0xff] }
  0xc0   : > { %770 = vst [vmem:[%s1291_s19 + $0x298] sm:$0xff] %v674_v19  ;;  %v675_v23 = vsel %vm387_vm4, %v579_v17, 0.0  ;;  %v580_v24 = vmul.f32 1.1111112, %v484_v20  ;;  %vm389_vm6 = vcmp.ge.f32.partialorder %v293_v21, 0.1 }
  0xc1   : > { %771 = vst [vmem:[%s1291_s19 + $0x2a0] sm:$0xff] %v675_v23  ;;  %v581_v26 = vmul.f32 1.1111112, %v485_v22  ;;  %vm390_vm7 = vcmp.ge.f32.partialorder %v294_v25, 0.1  ;;  %v295_v28 = vld [vmem:[%s1278_s29 + $0x2c0] sm:$0xff] }
  0xc2   : > { %v676_v29 = vsel %vm388_vm5, %v580_v24, 0.0  ;;  %v582_v30 = vmul.f32 1.1111112, %v486_v27  ;;  %vm391_vm8 = vcmp.ge.f32.partialorder %v295_v28, 0.1  ;;  %v487_v31 = vld [vmem:[%s1271_s17 + $0x2c0] sm:$0xff] }
  0xc3   : > { %772 = vst [vmem:[%s1291_s19 + $0x2a8] sm:$0xff] %v676_v29  ;;  %v677_v32 = vsel %vm389_vm6, %v581_v26, 0.0  ;;  %v583_v33 = vmul.f32 1.1111112, %v487_v31  ;;  %v296_v34 = vld [vmem:[%s1278_s29 + $0x2c8] sm:$0xff]  ;;  %v297_v36 = vld [vmem:[%s1278_s29 + $0x2d0] sm:$0xff] }
  0xc4   : > { %v488_v35 = vld [vmem:[%s1271_s17 + $0x2c8] sm:$0xff]  ;;  %773 = vst [vmem:[%s1291_s19 + $0x2b0] sm:$0xff] %v677_v32  ;;  %v678_v37 = vsel %vm390_vm7, %v582_v30, 0.0  ;;  %vm392_vm9 = vcmp.ge.f32.partialorder %v296_v34, 0.1  ;;  %v489_v39 = vld [vmem:[%s1271_s17 + $0x2d0] sm:$0xff] }
  0xc5   : > { %v584_v38 = vmul.f32 1.1111112, %v488_v35  ;;  %774 = vst [vmem:[%s1291_s19 + $0x2b8] sm:$0xff] %v678_v37  ;;  %v679_v40 = vsel %vm391_vm8, %v583_v33, 0.0  ;;  %vm393_vm10 = vcmp.ge.f32.partialorder %v297_v36, 0.1 }
  0xc6   : > { %v585_v41 = vmul.f32 1.1111112, %v489_v39  ;;  %v298_v42 = vld [vmem:[%s1278_s29 + $0x2d8] sm:$0xff]  ;;  %775 = vst [vmem:[%s1291_s19 + $0x2c0] sm:$0xff] %v679_v40  ;;  %v299_v45 = vld [vmem:[%s1278_s29 + $0x2e0] sm:$0xff]  ;;  %v300_v49 = vld [vmem:[%s1278_s29 + $0x2e8] sm:$0xff] }
  0xc7   : > { %v680_v43 = vsel %vm392_vm9, %v584_v38, 0.0  ;;  %vm394_vm11 = vcmp.ge.f32.partialorder %v298_v42, 0.1  ;;  %v490_v44 = vld [vmem:[%s1271_s17 + $0x2d8] sm:$0xff]  ;;  %v491_v46 = vld [vmem:[%s1271_s17 + $0x2e0] sm:$0xff]  ;;  %v492_v51 = vld [vmem:[%s1271_s17 + $0x2e8] sm:$0xff] }
  0xc8   : > { %776 = vst [vmem:[%s1291_s19 + $0x2c8] sm:$0xff] %v680_v43  ;;  %v681_v47 = vsel %vm393_vm10, %v585_v41, 0.0  ;;  %v586_v48 = vmul.f32 1.1111112, %v490_v44  ;;  %vm395_vm12 = vcmp.ge.f32.partialorder %v299_v45, 0.1 }
  0xc9   : > { %777 = vst [vmem:[%s1291_s19 + $0x2d0] sm:$0xff] %v681_v47  ;;  %v587_v50 = vmul.f32 1.1111112, %v491_v46  ;;  %vm396_vm13 = vcmp.ge.f32.partialorder %v300_v49, 0.1  ;;  %v301_v52 = vld [vmem:[%s1278_s29 + $0x2f0] sm:$0xff] }
  0xca   : > { %v682_v53 = vsel %vm394_vm11, %v586_v48, 0.0  ;;  %v588_v54 = vmul.f32 1.1111112, %v492_v51  ;;  %vm397_vm14 = vcmp.ge.f32.partialorder %v301_v52, 0.1  ;;  %v493_v55 = vld [vmem:[%s1271_s17 + $0x2f0] sm:$0xff] }
  0xcb   : > { %778 = vst [vmem:[%s1291_s19 + $0x2d8] sm:$0xff] %v682_v53  ;;  %v683_v56 = vsel %vm395_vm12, %v587_v50, 0.0  ;;  %v589_v57 = vmul.f32 1.1111112, %v493_v55  ;;  %v302_v58 = vld [vmem:[%s1278_s29 + $0x2f8] sm:$0xff]  ;;  %s1026_s25 = scalar_lea.vmem %s1575_s5, 12288 }
  0xcc   : > { %v494_v59 = vld [vmem:[%s1271_s17 + $0x2f8] sm:$0xff]  ;;  %779 = vst [vmem:[%s1291_s19 + $0x2e0] sm:$0xff] %v683_v56  ;;  %v684_v60 = vsel %vm396_vm13, %v588_v54, 0.0  ;;  %vm398_vm15 = vcmp.ge.f32.partialorder %v302_v58, 0.1  ;;  %p1027_p12 = scmp.ne.s32.totalorder %s1575_s5, %s1026_s25  ;;  %p1638_p0 = scmp.ne.s32.totalorder %s1633_s20, 0 }
  0xcd   : > { %v590_v61 = vmul.f32 1.1111112, %v494_v59  ;;  %780 = vst [vmem:[%s1291_s19 + $0x2e8] sm:$0xff] %v684_v60  ;;  %v685_v62 = vsel %vm397_vm14, %v589_v57, 0.0  ;;  %s1100_s26 = smov [#allocation7]  }
  0xce   : > { %781 = vst [vmem:[%s1291_s19 + $0x2f0] sm:$0xff] %v685_v62  ;;  %p1028_p2 = pnand %p1027_p12, %p1638_p0  ;;  %s1030_s22 = sshll.u32 %s1100_s26, 4  ;;  %s1031_s22 = int_to_ptr.vmem [resolvable:$false] %s1030_s22 }
  0xcf   : > { %v686_v63 = vsel %vm398_vm15, %v590_v61, 0.0  ;;  %s1032_s24 = scalar_lea.vmem %s1031_s22, 24576  ;;  %p1033_p9 = scmp.lt.s32.totalorder %s1575_s5, %s1031_s22 }
  0xd0   : > { %782 = vst [vmem:[%s1291_s19 + $0x2f8] sm:$0xff] %v686_v63  ;;  %p1029_p7 = pneg %p1028_p2  ;;  %p1034_p13 = scmp.lt.s32.totalorder %s1032_s24, %s1026_s25 }
  0xd2   : > { %p1035_p1 = por %p1034_p13, %p1033_p9 }
  0xd4   : > { %p1036_p3 = pnand %p1035_p1, %p1029_p7 }
  0xd6   : > { %1039 = shalt.err (!%p1036_p3)
}
  0xd7   : > { %s1040_s13 = scalar_lea.hbm %s1583_s27, 12288  ;;  %s1044_s30 = scalar_lea.hbm %s1629_s2, 36864 }
  0xd8   : > { %p1041_p10 = scmp.ne.s32.totalorder %s1583_s27, %s1040_s13  ;;  %p1045_p5 = scmp.lt.s32.totalorder %s1583_s27, %s1629_s2 }
  0xd9   : > { %p1046_p8 = scmp.lt.s32.totalorder %s1044_s30, %s1040_s13 }
  0xda   : > { %p1042_p11 = pnand %p1041_p10, %p1638_p0 }
  0xdb   : > { %p1047_p6 = por %p1046_p8, %p1045_p5 }
  0xdc   : > { %p1043_p4 = pneg %p1042_p11 }
  0xde   : > { %p1048_p12 = pnand %p1047_p6, %p1043_p4 }
  0xe0   : > { %1051 = shalt.err (!%p1048_p12)
}
  0xe1   : > { %s1101_s28 = smov 768   ;;  %s1102_s29 = smov 48  }
  0xe2   : > { %919 = dma.vmem_to_hbm [thread:$0]  (%p1638_p0), %s1575_s5, 12288, %s1583_s27, %s784_s23, %s1101_s28, %s1101_s28, %s1102_s29  }
  0xe3 PF: > { %p933_p2 = scmp.ge.s32.totalorder %s1094_s12, 2  ;;  %s813_s4 = sand.u32 1, %s1082_s9  }
  0xe4   : > { %p1639_p7 = scmp.ne.s32.totalorder %s1634_s21, 0  ;;  %s814_s19 = scalar_lea.sflag [#allocation4], %s813_s4 }
  0xe6   : > { %p929_p9 = pnand %p933_p2, %p1639_p7 }
  0xe8   : > { %p930_p13 = pneg %p929_p9 }
  0xea   : > { %1077 = dma.done.wait (%p930_p13), %s814_s19, 12288  }
  0xeb   : > { %1079 = vsyncadd (%p930_p13), %s814_s19, 4294955008  ;;  %p18_p1 = scmp.ge.s32.totalorder %s1143_s15, 5   ;;  %s1640_s9 = smov %s1086_s10 }
  0xec   : > { %s1641_s10 = smov %s1090_s11  ;;  %s1642_s11 = smov %s1155_s18 }
  0xed   : > { %s1643_s12 = smov %s1143_s15  ;;  %20 = sbr.rel (!%p18_p1) target bundleno = 7 (0x7), region = 86 }
  0xf2   :  { %819 = vsyncpa [#allocation3], 1 }
  0xf3   :  { %821 = vsyncpa [#allocation3 + $0x1], 1 }
  0xf4   :  { %822 = vsyncpa [#allocation6], 1 }
  0xf5   :  { %824 = vsyncpa [#allocation6 + $0x1], 1 }
  0xf6   :  { %825 = vsyncpa [#allocation4], 1 }
  0xf7   :  { %827 = vsyncpa [#allocation4 + $0x1], 1 }

</bundles_post_ra>
